<compile_context>
chip_gen: v7x
topology: tpu7x:2x2x1
jax: 0.10.0
libtpu: 0.0.40
codegen_flags: <defaults>
</compile_context>

<pallas_src>
import functools

import jax
import jax.numpy as jnp
from jax.experimental import pallas as pl
from jax.experimental.pallas import tpu as pltpu


def mdn_kernel(x_ref, wh_ref, bh_ref, wheads_ref, bheads_ref, out_ref, *,
               n_gaussian):
    G = n_gaussian

    # Hidden layer: K=1 "matmul" as a VPU broadcast multiply-add.
    #   (H, 1) * (1, TB) + (H, 1) -> (H, TB)
    x = x_ref[...]                                             # (1, TB)
    z_h = jnp.tanh(wh_ref[...] * x + bh_ref[...])              # (H, TB)

    # Fused heads: single MXU dot  (3G, H) @ (H, TB) + (3G, 1) -> (3G, TB)
    heads = jnp.dot(wheads_ref[...], z_h,
                    preferred_element_type=jnp.float32) + bheads_ref[...]

    # pi head: numerically-stable softmax over the gaussian (sublane) axis.
    logits = heads[0:G, :]
    m = jnp.max(logits, axis=0, keepdims=True)
    e = jnp.exp(logits - m)
    denom = jnp.sum(e, axis=0, keepdims=True)
    pi = e * pl.reciprocal(denom, approx=False)

    # mu head: plain linear.  sigma head: exp(linear).
    mu = heads[G:2 * G, :]
    sigma = jnp.exp(heads[2 * G:3 * G, :])

    # Single fused, lane-dense output slab (3G, TB).
    out_ref[0:G, :] = pi
    out_ref[G:2 * G, :] = mu
    out_ref[2 * G:3 * G, :] = sigma


def mdn_forward(x, params, *, tile_b=1024):
    """x: (N, 1) f32.  params: PyTorch-oriented weights/biases (see init)."""
    N = x.shape[0]
    H = params["wh"].shape[0]
    G = params["wpi"].shape[0]

    tile_b = min(tile_b, N)
    assert tile_b % 128 == 0, "tile_b must be a multiple of 128"
    assert N % tile_b == 0, "batch must be a multiple of tile_b"

    # (N, 1) -> (1, N): batch onto the lane axis (contiguous, no data motion).
    x_t = x.reshape(1, N)

    # Fuse the three heads: (3G, H) weight, (3G, 1) bias.
    wh = params["wh"].reshape(H, 1)
    bh = params["bh"].reshape(H, 1)
    w_heads = jnp.concatenate(
        [params["wpi"], params["wmu"], params["wsig"]], axis=0)       # (3G, H)
    b_heads = jnp.concatenate(
        [params["bpi"], params["bmu"], params["bsig"]], axis=0
    ).reshape(3 * G, 1)                                               # (3G, 1)

    grid = (N // tile_b,)

    def full(shape):
        return pl.BlockSpec(shape, lambda i: (0, 0))

    out = pl.pallas_call(
        functools.partial(mdn_kernel, n_gaussian=G),
        out_shape=jax.ShapeDtypeStruct((3 * G, N), jnp.float32),
        grid_spec=pltpu.PrefetchScalarGridSpec(
            num_scalar_prefetch=0,
            grid=grid,
            in_specs=[
                pl.BlockSpec((1, tile_b), lambda i: (0, i)),   # x (batch->lanes)
                full((H, 1)), full((H, 1)),                    # wh, bh
                full((3 * G, H)), full((3 * G, 1)),            # fused heads
            ],
            out_specs=pl.BlockSpec((3 * G, tile_b), lambda i: (0, i)),
        ),
        compiler_params=pltpu.CompilerParams(
            dimension_semantics=("parallel",)),
    )(x_t, wh, bh, w_heads, b_heads)

    # Split fused slab and return batch-major (N, G) to match the PyTorch API.
    pi = out[0:G, :].T
    mu = out[G:2 * G, :].T
    sigma = out[2 * G:3 * G, :].T
    return pi, mu, sigma


def init_params(key, n_hidden, n_gaussian):
    """nn.Linear-style init (U[-1/sqrt(fan_in), 1/sqrt(fan_in)]), PyTorch layout."""
    ks = jax.random.split(key, 8)

    def uniform(k, shape, fan_in):
        bound = 1.0 / jnp.sqrt(jnp.float32(fan_in))
        return jax.random.uniform(k, shape, jnp.float32, -bound, bound)

    # Weights stored as (out, in), biases as (out,) — same as nn.Linear.
    return {
        "wh":   uniform(ks[0], (n_hidden, 1), 1),
        "bh":   uniform(ks[1], (n_hidden,), 1),
        "wpi":  uniform(ks[2], (n_gaussian, n_hidden), n_hidden),
        "bpi":  uniform(ks[3], (n_gaussian,), n_hidden),
        "wmu":  uniform(ks[4], (n_gaussian, n_hidden), n_hidden),
        "bmu":  uniform(ks[5], (n_gaussian,), n_hidden),
        "wsig": uniform(ks[6], (n_gaussian, n_hidden), n_hidden),
        "bsig": uniform(ks[7], (n_gaussian,), n_hidden),
    }


def mdn_ref(x, p):
    """Pure-JAX reference for correctness check (matches PyTorch module)."""
    z_h = jnp.tanh(x @ p["wh"].T + p["bh"])
    pi = jax.nn.softmax(z_h @ p["wpi"].T + p["bpi"], axis=-1)
    mu = z_h @ p["wmu"].T + p["bmu"]
    sigma = jnp.exp(z_h @ p["wsig"].T + p["bsig"])
    return pi, mu, sigma


if __name__ == "__main__":
    key = jax.random.PRNGKey(0)
    k_x, k_p = jax.random.split(key)

    N, n_hidden, n_gaussian = 2048, 32, 8
    x = jax.random.normal(k_x, (N, 1), jnp.float32)
    params = init_params(k_p, n_hidden, n_gaussian)

    pi, mu, sigma = mdn_forward(x, params, tile_b=1024)
    jax.block_until_ready((pi, mu, sigma))

    pi_r, mu_r, sigma_r = mdn_ref(x, params)
    assert jnp.allclose(pi, pi_r, atol=1e-5, rtol=1e-5)
    assert jnp.allclose(mu, mu_r, atol=1e-5, rtol=1e-5)
    assert jnp.allclose(sigma, sigma_r, atol=1e-4, rtol=1e-5)
    # pi rows should sum to 1
    assert jnp.allclose(jnp.sum(pi, axis=-1), 1.0, atol=1e-5)

    print("KERNEL_OK")
</pallas_src>

<mosaic_0001>
module attributes {stable_mosaic.version = 11 : i64} {
  func.func @mdn_kernel(%arg0: i32, %arg1: memref<1x1024xf32, #tpu.memory_space<vmem>>, %arg2: memref<32x1xf32, #tpu.memory_space<vmem>>, %arg3: memref<32x1xf32, #tpu.memory_space<vmem>>, %arg4: memref<24x32xf32, #tpu.memory_space<vmem>>, %arg5: memref<24x1xf32, #tpu.memory_space<vmem>>, %arg6: memref<24x1024xf32, #tpu.memory_space<vmem>>) attributes {dimension_semantics = [#tpu.dimension_semantics<parallel>], iteration_bounds = array<i64: 2>, scalar_prefetch = 0 : i64, scratch_operands = 0 : i64, tpu.core_type = #tpu.core_type<tc>, window_params = [{transform_indices = @transform_0, window_bounds = array<i64: 1, 1024>}, {pipeline_mode = #tpu.pipeline_mode<synchronous>, transform_indices = @transform_1, window_bounds = array<i64: 32, 1>}, {pipeline_mode = #tpu.pipeline_mode<synchronous>, transform_indices = @transform_2, window_bounds = array<i64: 32, 1>}, {pipeline_mode = #tpu.pipeline_mode<synchronous>, transform_indices = @transform_3, window_bounds = array<i64: 24, 32>}, {pipeline_mode = #tpu.pipeline_mode<synchronous>, transform_indices = @transform_4, window_bounds = array<i64: 24, 1>}, {transform_indices = @transform_5, window_bounds = array<i64: 24, 1024>}]} {
    %c0 = arith.constant 0 : index
    %c0_0 = arith.constant 0 : index
    %0 = vector.load %arg1[%c0, %c0_0] : memref<1x1024xf32, #tpu.memory_space<vmem>>, vector<1x1024xf32>
    %c0_1 = arith.constant 0 : index
    %c0_2 = arith.constant 0 : index
    %1 = vector.load %arg2[%c0_1, %c0_2] : memref<32x1xf32, #tpu.memory_space<vmem>>, vector<32x1xf32>
    %2 = vector.broadcast %1 : vector<32x1xf32> to vector<32x1024xf32>
    %3 = vector.broadcast %0 : vector<1x1024xf32> to vector<32x1024xf32>
    %4 = arith.mulf %2, %3 : vector<32x1024xf32>
    %c0_3 = arith.constant 0 : index
    %c0_4 = arith.constant 0 : index
    %5 = vector.load %arg3[%c0_3, %c0_4] : memref<32x1xf32, #tpu.memory_space<vmem>>, vector<32x1xf32>
    %6 = vector.broadcast %5 : vector<32x1xf32> to vector<32x1024xf32>
    %7 = arith.addf %4, %6 : vector<32x1024xf32>
    %8 = math.tanh %7 : vector<32x1024xf32>
    %c0_5 = arith.constant 0 : index
    %c0_6 = arith.constant 0 : index
    %9 = vector.load %arg4[%c0_5, %c0_6] : memref<24x32xf32, #tpu.memory_space<vmem>>, vector<24x32xf32>
    %cst = arith.constant dense<0.000000e+00> : vector<24x1024xf32>
    %10 = tpu.matmul %9, %8, %cst {dimension_numbers = #tpu.dot_dimension_numbers<[1], [0], [0], [1], [0, 0, 1, 1], [], []>} : vector<24x32xf32>, vector<32x1024xf32>, vector<24x1024xf32> -> vector<24x1024xf32>
    %c0_7 = arith.constant 0 : index
    %c0_8 = arith.constant 0 : index
    %11 = vector.load %arg5[%c0_7, %c0_8] : memref<24x1xf32, #tpu.memory_space<vmem>>, vector<24x1xf32>
    %12 = vector.broadcast %11 : vector<24x1xf32> to vector<24x1024xf32>
    %13 = arith.addf %10, %12 : vector<24x1024xf32>
    %14 = vector.extract_strided_slice %13 {offsets = [0, 0], sizes = [8, 1024], strides = [1, 1]} : vector<24x1024xf32> to vector<8x1024xf32>
    %cst_9 = arith.constant dense<0xFF800000> : vector<1024xf32>
    %15 = vector.multi_reduction <maximumf>, %14, %cst_9 [0] : vector<8x1024xf32> to vector<1024xf32>
    %16 = vector.shape_cast %15 : vector<1024xf32> to vector<1x1024xf32>
    %17 = vector.broadcast %16 : vector<1x1024xf32> to vector<8x1024xf32>
    %18 = arith.subf %14, %17 : vector<8x1024xf32>
    %19 = math.exp %18 : vector<8x1024xf32>
    %cst_10 = arith.constant dense<0.000000e+00> : vector<1024xf32>
    %20 = vector.multi_reduction <add>, %19, %cst_10 [0] : vector<8x1024xf32> to vector<1024xf32>
    %21 = vector.shape_cast %20 : vector<1024xf32> to vector<1x1024xf32>
    %22 = tpu.reciprocal %21 : vector<1x1024xf32> -> vector<1x1024xf32>
    %23 = vector.broadcast %22 : vector<1x1024xf32> to vector<8x1024xf32>
    %24 = arith.mulf %19, %23 : vector<8x1024xf32>
    %25 = vector.extract_strided_slice %13 {offsets = [8, 0], sizes = [8, 1024], strides = [1, 1]} : vector<24x1024xf32> to vector<8x1024xf32>
    %26 = vector.extract_strided_slice %13 {offsets = [16, 0], sizes = [8, 1024], strides = [1, 1]} : vector<24x1024xf32> to vector<8x1024xf32>
    %27 = math.exp %26 : vector<8x1024xf32>
    %c0_11 = arith.constant 0 : index
    %c0_12 = arith.constant 0 : index
    %28 = vector.load %arg6[%c0_11, %c0_12] : memref<24x1024xf32, #tpu.memory_space<vmem>>, vector<8x1024xf32>
    tpu.vector_store %arg6[%c0_11, %c0_12], %24 {strides = array<i32>} : memref<24x1024xf32, #tpu.memory_space<vmem>>, vector<8x1024xf32>,
    %c8 = arith.constant 8 : index
    %c0_13 = arith.constant 0 : index
    %29 = vector.load %arg6[%c8, %c0_13] : memref<24x1024xf32, #tpu.memory_space<vmem>>, vector<8x1024xf32>
    tpu.vector_store %arg6[%c8, %c0_13], %25 {strides = array<i32>} : memref<24x1024xf32, #tpu.memory_space<vmem>>, vector<8x1024xf32>,
    %c16 = arith.constant 16 : index
    %c0_14 = arith.constant 0 : index
    %30 = vector.load %arg6[%c16, %c0_14] : memref<24x1024xf32, #tpu.memory_space<vmem>>, vector<8x1024xf32>
    tpu.vector_store %arg6[%c16, %c0_14], %27 {strides = array<i32>} : memref<24x1024xf32, #tpu.memory_space<vmem>>, vector<8x1024xf32>,
    return
  }
  func.func @transform_0(%arg0: i32) -> (i32, i32) {
    %c0_i32 = arith.constant 0 : i32
    %c0_i32_0 = arith.constant 0 : i32
    return %c0_i32, %arg0 : i32, i32
  }
  func.func @transform_1(%arg0: i32) -> (i32, i32) {
    %c0_i32 = arith.constant 0 : i32
    %c0_i32_0 = arith.constant 0 : i32
    %c0_i32_1 = arith.constant 0 : i32
    return %c0_i32, %c0_i32_0 : i32, i32
  }
  func.func @transform_2(%arg0: i32) -> (i32, i32) {
    %c0_i32 = arith.constant 0 : i32
    %c0_i32_0 = arith.constant 0 : i32
    %c0_i32_1 = arith.constant 0 : i32
    return %c0_i32, %c0_i32_0 : i32, i32
  }
  func.func @transform_3(%arg0: i32) -> (i32, i32) {
    %c0_i32 = arith.constant 0 : i32
    %c0_i32_0 = arith.constant 0 : i32
    %c0_i32_1 = arith.constant 0 : i32
    return %c0_i32, %c0_i32_0 : i32, i32
  }
  func.func @transform_4(%arg0: i32) -> (i32, i32) {
    %c0_i32 = arith.constant 0 : i32
    %c0_i32_0 = arith.constant 0 : i32
    %c0_i32_1 = arith.constant 0 : i32
    return %c0_i32, %c0_i32_0 : i32, i32
  }
  func.func @transform_5(%arg0: i32) -> (i32, i32) {
    %c0_i32 = arith.constant 0 : i32
    %c0_i32_0 = arith.constant 0 : i32
    return %c0_i32, %arg0 : i32, i32
  }
}

</mosaic_0001>

<bundles_post_ra>
// kernel: tpu_custom_call.1
= control target key start
LH: loop header
LB: loop body
LE: loop exit
PB: predicated region body
PF: predicated region fallthrough
CT: control target
= control target key end

     0   :  { %10 = vsyncpa [#allocation3], 0  ;;  %s1747_s0 = inlined_call_operand.vmem [shape: f32[1,2048], index: 0, kind: input, shape index: {}]   ;;  %s1748_s1 = inlined_call_operand.vmem [shape: f32[32,1], index: 1, kind: input, shape index: {}]   ;;  %s1749_s2 = inlined_call_operand.vmem [shape: f32[32,1], index: 2, kind: input, shape index: {}]   ;;  %s1750_s3 = inlined_call_operand.vmem [shape: f32[24,32], index: 3, kind: input, shape index: {}]   ;;  %s1751_s4 = inlined_call_operand.vmem [shape: f32[24,1], index: 4, kind: input, shape index: {}]   ;;  %s1752_s5 = inlined_call_operand.hbm [shape: f32[24,2048], index: 5, kind: output, shape index: {}]  }
   0x1   :  { %12 = vsyncpa [#allocation3 + $0x1], 0  ;;  %s1334_s18 = smov 0   ;;  %s1336_s19 = smov 0  }
   0x2   :  { %s1338_s20 = smov 0   ;;  %s1340_s21 = smov 0  }
   0x3 LB: > { %s1355_s22 = sadd.s32 4294967295, %s1296_s21   ;;  %s1021_s23 = sadd.s32 4294967294, %s1296_s21   ;;  %s1296_s21 = sphi %s1340_s21, %s1758_s21   ;;  %s1292_s20 = sphi %s1338_s20, %s1757_s20   ;;  %s1288_s19 = sphi %s1336_s19, %s1756_s19   ;;  %s1284_s18 = sphi %s1334_s18, %s1755_s18  }
   0x4   : > { %s1359_s24 = sadd.s32 1, %s1296_s21   ;;  %s135_s25 = sadd.s32 1, %s1292_s20 }
   0x5   : > { %s132_s26 = ssub.s32 %s1296_s21, %s1359_s24  ;;  %p145_p0 = scmp.ne.s32.totalorder %s1292_s20, %s1288_s19 }
   0x6   : > { %p133_p1 = scmp.eq.s32.totalorder %s132_s26, 0  ;;  %p146_p2 = scmp.eq.s32.totalorder %s1355_s22, 1 }
   0x7   : > { %p151_p3 = scmp.ne.s32.totalorder %s1288_s19, %s1284_s18  ;;  %p152_p4 = scmp.eq.s32.totalorder %s1021_s23, 1 }
   0x8   : > { %s1370_s27 = scalar_select %p133_p1, %s1292_s20, %s135_s25  }
   0x9   : > { %p1372_p5 = por %p146_p2, %p145_p0  ;;  %p1376_p6 = por %p152_p4, %p151_p3 }
   0xa   : > { %p1024_p7 = scmp.ge.s32.totalorder %s1296_s21, 1  ;;  %p190_p8 = scmp.lt.s32.totalorder %s1296_s21, 3 }
   0xc   : > { %p191_p9 = pnand %p1024_p7, %p190_p8 }
   0xd   : > { %v321_v0 = vld [vmem:[%s1749_s2] sm:$0xff] (!%p191_p9)  ;;  %v1298_v2 = vmov (!%p191_p9), 0   ;;  %v322_v3 = vld [vmem:[%s1749_s2 + $0x8] sm:$0xff] (!%p191_p9)  ;;  %v227_v5 = vld [vmem:[%s1748_s1 + $0x18] sm:$0xff] (!%p191_p9)  ;;  %v1299_v12 = vmov (!%p191_p9), 0.0   ;;  %s1025_s11 = sshll.u32 (!%p191_p9), %s1355_s22, 3  ;;  %v249_v13 = vlaneseq (!%p191_p9) }
   0xe   : > { %194 = sbr.rel (%p191_p9) target bundleno = 479 (0x1df), region = 40  ;;  %v224_v1 = vld [vmem:[%s1748_s1] sm:$0xff] (!%p191_p9)  ;;  %1121 = vset.pattern.permute.xlu1 (!%p191_p9), %v1298_v2  ;;  %1120 = vset.pattern.permute.xlu0 (!%p191_p9), %v1298_v2  ;;  %v225_v4 = vld [vmem:[%s1748_s1 + $0x8] sm:$0xff] (!%p191_p9)  ;;  %v226_v6 = vld [vmem:[%s1748_s1 + $0x10] sm:$0xff] (!%p191_p9)  ;;  %p218_p10 = scmp.lt.s32.totalorder (!%p191_p9), %s1025_s11, 15  ;;  %vm430_vm0 = vcmask (!%p191_p9), 261120  }
   0xf   : > { %327 = vperm.xlu1 (!%p191_p9), %1121, %v321_v0   ;;  %230 = vperm.xlu0 (!%p191_p9), %1120, %v224_v1   ;;  %v324_v7 = vld [vmem:[%s1749_s2 + $0x18] sm:$0xff] (!%p191_p9)  ;;  %v323_v8 = vld [vmem:[%s1749_s2 + $0x10] sm:$0xff] (!%p191_p9)  ;;  %v412_v10 = vld [vmem:[%s1751_s4] sm:$0xff] (!%p191_p9)  ;;  %v1418_v14 = vshrl.u32 (!%p191_p9), %v249_v13, 7  ;;  %s214_s30 = sand.u32 (!%p191_p9), 1, %s1288_s19   ;;  %s1042_s8 = sshll.u32 (!%p191_p9), %s1355_s22, 10 }
  0x10   : > { %v414_v9 = vld [vmem:[%s1751_s4 + $0x10] sm:$0xff] (!%p191_p9)  ;;  %v413_v11 = vld [vmem:[%s1751_s4 + $0x8] sm:$0xff] (!%p191_p9)  ;;  %504 = vmatprep.mubr.f32.mxu0 (!%p191_p9), %v1299_v12  ;;  %587 = vmatprep.mubr.f32.mxu1 (!%p191_p9), %v1299_v12  ;;  %s1075_s6 = smul.u32 (!%p191_p9), 192, %s214_s30  ;;  %s1696_s12 = scalar_lea.hbm (!%p191_p9), %s1752_s5, %s1042_s8 }
  0x11   : > { %v255_v15 = vsub.s32 (!%p191_p9), 1, %v1418_v14  ;;  %v263_v16 = vsub.s32 (!%p191_p9), 3, %v1418_v14  ;;  %v251_v18 = vsub.s32 (!%p191_p9), 0, %v1418_v14  ;;  %v259_v19 = vsub.s32 (!%p191_p9), 2, %v1418_v14  ;;  %s1706_s22 = scalar_lea.sflag (!%p191_p9), [#allocation3], %s214_s30 }
  0x12   : > { %v271_v37 = vsub.s32 (!%p191_p9), 5, %v1418_v14  ;;  %v279_v46 = vsub.s32 (!%p191_p9), 7, %v1418_v14  ;;  %v267_v48 = vsub.s32 (!%p191_p9), 4, %v1418_v14  ;;  %v275_v49 = vsub.s32 (!%p191_p9), 6, %v1418_v14  ;;  %s1604_s7 = scalar_lea.vmem (!%p191_p9), [#allocation2], %s1075_s6 }
  0x13   : > { %332 = vperm.xlu1 (!%p191_p9), %1121, %v322_v3   ;;  %235 = vperm.xlu0 (!%p191_p9), %1120, %v225_v4   ;;  %s962_s9 = sshll.u32 (!%p191_p9), %s1604_s7, 4  ;;  %s1699_s9 = int_to_ptr.vmem [resolvable:$true] %s962_s9 }
  0x14   : > { %s1234_s13 = scalar_lea.vmem (!%p191_p9), %s1699_s9, 3072 }
  0x15   : > { %s1760_s11 = smov (!%p218_p10, %s1025_s11), 15  ;;  %p1235_p11 = scmp.ne.s32.totalorder %s1699_s9, %s1234_s13 }
  0x16   : > { %s220_s14 = scalar_lea.vmem %s1747_s0, %s1760_s11 }
  0x17   : > { %245 = vperm.xlu1 %1121, %v227_v5   ;;  %240 = vperm.xlu0 %1120, %v226_v6   ;;  %v1425_v17 = vld [vmem:[%s220_s14] sm:$0xff]  ;;  %p1236_p12 = pnand %p1235_p11, %p1372_p5  ;;  %s1300_s14 = smov [#allocation2]  }
  0x18   : > { %v256_v20 = vrot.slane %v1425_v17, %v255_v15  ;;  %v264_v21 = vrot.slane %v1425_v17, %v263_v16  ;;  %v252_v22 = vrot.slane %v1425_v17, %v251_v18  ;;  %v260_v23 = vrot.slane %v1425_v17, %v259_v19  ;;  %s1238_s15 = sshll.u32 %s1300_s14, 4  ;;  %s1239_s15 = int_to_ptr.vmem [resolvable:$false] %s1238_s15 }
  0x19   : > { %v1466_v50 = vrot.slane %v1425_v17, %v271_v37  ;;  %v1478_v58 = vrot.slane %v1425_v17, %v279_v46  ;;  %v1484_v62 = vrot.slane %v1425_v17, %v267_v48  ;;  %p1237_p13 = pneg %p1236_p12  ;;  %s1240_s16 = scalar_lea.vmem %s1239_s15, 6144 }
  0x1a   : > { %p1241_p0 = scmp.lt.s32.totalorder %s1699_s9, %s1239_s15  ;;  %p1242_p1 = scmp.lt.s32.totalorder %s1240_s16, %s1234_s13 }
  0x1b   : > { %342 = vperm.xlu1 %1121, %v324_v7   ;;  %337 = vperm.xlu0 %1120, %v323_v8  }
  0x1c   : > { %p1243_p2 = por %p1242_p1, %p1241_p0 }
  0x1e   : > { %p1244_p3 = pnand %p1243_p2, %p1237_p13 }
  0x1f   : > { %427 = vperm.xlu1 %1121, %v414_v9   ;;  %417 = vperm.xlu0 %1120, %v412_v10   ;;  %v1497_v9 = vrot.slane %v1425_v17, %v275_v49 }
  0x23   : > { %422 = vperm.xlu0 %1120, %v413_v11  }
  0x8e   : > { %v1433_v24 = vpop.permute.xlu1 %327  ;;  %v1435_v25 = vpop.permute.xlu0 %230 }
  0x8f   : > { %v290_v26 = vmul.f32 %v256_v20, %v1435_v25  ;;  %v292_v27 = vmul.f32 %v264_v21, %v1435_v25  ;;  %v289_v28 = vmul.f32 %v252_v22, %v1435_v25  ;;  %v291_v29 = vmul.f32 %v260_v23, %v1435_v25 }
  0x90   : > { %v294_v3 = vmul.f32 %v1466_v50, %v1435_v25  ;;  %v296_v11 = vmul.f32 %v1478_v58, %v1435_v25  ;;  %v293_v18 = vmul.f32 %v1484_v62, %v1435_v25 }
  0x91   : > { %v346_v30 = vadd.f32 %v1433_v24, %v290_v26  ;;  %v348_v31 = vadd.f32 %v1433_v24, %v292_v27  ;;  %v345_v34 = vadd.f32 %v1433_v24, %v289_v28  ;;  %v347_v36 = vadd.f32 %v1433_v24, %v291_v29 }
  0x92   : > { %v1443_v32 = vpop.permute.xlu1 %332  ;;  %v1445_v33 = vpop.permute.xlu0 %235  ;;  %v350_v17 = vadd.f32 %v1433_v24, %v294_v3  ;;  %v352_v27 = vadd.f32 %v1433_v24, %v296_v11 }
  0x93   : > { %v298_v35 = vmul.f32 %v256_v20, %v1445_v33  ;;  %1122 = vtanh.f32 %v346_v30  ;;  %v300_v38 = vmul.f32 %v264_v21, %v1445_v33  ;;  %v297_v39 = vmul.f32 %v252_v22, %v1445_v33 }
  0x94   : > { %v299_v40 = vmul.f32 %v260_v23, %v1445_v33  ;;  %1124 = vtanh.f32 %v348_v31  ;;  %v302_v7 = vmul.f32 %v1466_v50, %v1445_v33  ;;  %v304_v15 = vmul.f32 %v1478_v58, %v1445_v33 }
  0x95   : > { %v354_v41 = vadd.f32 %v1443_v32, %v298_v35  ;;  %v356_v44 = vadd.f32 %v1443_v32, %v300_v38  ;;  %v353_v45 = vadd.f32 %v1443_v32, %v297_v39  ;;  %1126 = vtanh.f32 %v345_v34 }
  0x96   : > { %v1455_v42 = vpop.permute.xlu1 %245  ;;  %v1457_v43 = vpop.permute.xlu0 %240  ;;  %v355_v47 = vadd.f32 %v1443_v32, %v299_v40  ;;  %1128 = vtanh.f32 %v347_v36  ;;  %v303_v29 = vmul.f32 %v1497_v9, %v1445_v33  ;;  %v360_v31 = vadd.f32 %v1443_v32, %v304_v15 }
  0x97   : > { %1130 = vtanh.f32 %v354_v41  ;;  %v306_v51 = vmul.f32 %v256_v20, %v1457_v43  ;;  %v314_v52 = vmul.f32 %v256_v20, %v1455_v42  ;;  %v308_v53 = vmul.f32 %v264_v21, %v1457_v43 }
  0x98   : > { %1132 = vtanh.f32 %v356_v44  ;;  %v316_v56 = vmul.f32 %v264_v21, %v1455_v42  ;;  %v305_v57 = vmul.f32 %v252_v22, %v1457_v43  ;;  %v313_v0 = vmul.f32 %v252_v22, %v1455_v42 }
  0x99   : > { %1134 = vtanh.f32 %v353_v45  ;;  %v307_v2 = vmul.f32 %v260_v23, %v1457_v43  ;;  %v315_v6 = vmul.f32 %v260_v23, %v1455_v42  ;;  %v301_v20 = vmul.f32 %v1484_v62, %v1445_v33 }
  0x9a   : > { %v1471_v54 = vpop.permute.xlu1 %342  ;;  %v1473_v55 = vpop.permute.xlu0 %337  ;;  %1136 = vtanh.f32 %v355_v47  ;;  %v358_v21 = vadd.f32 %v1443_v32, %v302_v7  ;;  %v295_v23 = vmul.f32 %v1497_v9, %v1435_v25  ;;  %v349_v36 = vadd.f32 %v1433_v24, %v293_v18  ;;  %v411_v18 = vld [vmem:[%s1750_s3 + $0x10] sm:$0xff] }
  0x9b   : > { %v362_v59 = vadd.f32 %v1473_v55, %v306_v51  ;;  %v370_v60 = vadd.f32 %v1471_v54, %v314_v52  ;;  %v364_v61 = vadd.f32 %v1473_v55, %v308_v53  ;;  %v372_v63 = vadd.f32 %v1471_v54, %v316_v56 }
  0x9c   : > { %v361_v1 = vadd.f32 %v1473_v55, %v305_v57  ;;  %v369_v5 = vadd.f32 %v1471_v54, %v313_v0  ;;  %v363_v10 = vadd.f32 %v1473_v55, %v307_v2  ;;  %v371_v14 = vadd.f32 %v1471_v54, %v315_v6 }
  0x9d   : > { %1138 = vtanh.f32 %v362_v59  ;;  %v1123_v4 = vpop.eup %1122  ;;  %v357_v37 = vadd.f32 %v1443_v32, %v301_v20  ;;  %v351_v33 = vadd.f32 %v1433_v24, %v295_v23  ;;  %v310_v39 = vmul.f32 %v1466_v50, %v1457_v43 }
  0x9e   : > { %1140 = vtanh.f32 %v370_v60  ;;  %v1125_v8 = vpop.eup %1124  ;;  %v359_v41 = vadd.f32 %v1443_v32, %v303_v29  ;;  %v318_v44 = vmul.f32 %v1466_v50, %v1455_v42  ;;  %v312_v48 = vmul.f32 %v1478_v58, %v1457_v43 }
  0x9f   : > { %1142 = vtanh.f32 %v364_v61  ;;  %v1127_v13 = vpop.eup %1126  ;;  %v366_v47 = vadd.f32 %v1473_v55, %v310_v39  ;;  %v320_v51 = vmul.f32 %v1478_v58, %v1455_v42  ;;  %v309_v32 = vmul.f32 %v1484_v62, %v1457_v43 }
  0xa0   : > { %1144 = vtanh.f32 %v372_v63  ;;  %v1129_v16 = vpop.eup %1128  ;;  %v374_v49 = vadd.f32 %v1471_v54, %v318_v44  ;;  %v368_v53 = vadd.f32 %v1473_v55, %v312_v48  ;;  %v317_v57 = vmul.f32 %v1484_v62, %v1455_v42 }
  0xa1   : > { %1146 = vtanh.f32 %v361_v1  ;;  %v1131_v19 = vpop.eup %1130  ;;  %v376_v59 = vadd.f32 %v1471_v54, %v320_v51  ;;  %v311_v58 = vmul.f32 %v1497_v9, %v1457_v43  ;;  %v365_v63 = vadd.f32 %v1473_v55, %v309_v32 }
  0xa2   : > { %1148 = vtanh.f32 %v369_v5  ;;  %v1133_v22 = vpop.eup %1132  ;;  %v1043_v26 = vpack.c.bf16 %v1131_v19, %v1123_v4  ;;  %v319_v1 = vmul.f32 %v1497_v9, %v1455_v42  ;;  %v373_v2 = vadd.f32 %v1471_v54, %v317_v57  ;;  %v409_v4 = vld [vmem:[%s1750_s3] sm:$0xff]  ;;  %v1608_v57 = vpop.permute.xlu1 %427 }
  0xa3   : > { %1150 = vtanh.f32 %v363_v10  ;;  %v1135_v28 = vpop.eup %1134  ;;  %v1051_v30 = vpack.c.bf16 %v1133_v22, %v1125_v8  ;;  %v367_v43 = vadd.f32 %v1473_v55, %v311_v58  ;;  %v410_v55 = vld [vmem:[%s1750_s3 + $0x8] sm:$0xff] }
  0xa4   : > { %1152 = vtanh.f32 %v371_v14  ;;  %v1137_v34 = vpop.eup %1136  ;;  %1044 = vmatprep.subr.bf16.mxu0 %v1043_v26  ;;  %v1045_v35 = vpack.c.bf16 %v1135_v28, %v1127_v13  ;;  %v375_v6 = vadd.f32 %v1471_v54, %v319_v1 }
  0xa5   : > { %1154 = vtanh.f32 %v350_v17  ;;  %1052 = vmatprep.subr.bf16.mxu1 %v1051_v30  ;;  %v1053_v25 = vpack.c.bf16 %v1137_v34, %v1129_v16 }
  0xa6   : > { %1156 = vtanh.f32 %v358_v21  ;;  %1046 = vmatpush1.bf16.msra.mxu0 %v1045_v35 }
  0xa7   : > { %v1139_v38 = vpop.eup %1138  ;;  %1158 = vtanh.f32 %v352_v27  ;;  %1054 = vmatpush1.bf16.msra.mxu1 %v1053_v25 }
  0xa8   : > { %v1141_v40 = vpop.eup %1140  ;;  %1160 = vtanh.f32 %v360_v31  ;;  %v1577_v31 = vpop.permute.xlu0 %417 }
  0xa9   : > { %v1143_v45 = vpop.eup %1142  ;;  %v1047_v46 = vpack.c.bf16 %v1141_v40, %v1139_v38  ;;  %1162 = vtanh.f32 %v349_v36 }
  0xaa   : > { %v1145_v24 = vpop.eup %1144  ;;  %1164 = vtanh.f32 %v357_v37 }
  0xab   : > { %v1147_v52 = vpop.eup %1146  ;;  %1048 = vmatprep.subr.bf16.mxu0 %v1047_v46  ;;  %v1055_v50 = vpack.c.bf16 %v1145_v24, %v1143_v45  ;;  %1166 = vtanh.f32 %v351_v33 }
  0xac   : > { %v1149_v56 = vpop.eup %1148  ;;  %1168 = vtanh.f32 %v359_v41  ;;  %v1591_v39 = vpop.permute.xlu0 %422 }
  0xad   : > { %v1151_v60 = vpop.eup %1150  ;;  %1056 = vmatprep.subr.bf16.mxu1 %v1055_v50  ;;  %v1049_v61 = vpack.c.bf16 %v1149_v56, %v1147_v52  ;;  %1170 = vtanh.f32 %v366_v47 }
  0xae   : > { %v1153_v0 = vpop.eup %1152  ;;  %1172 = vtanh.f32 %v374_v49 }
  0xaf   : > { %v1155_v62 = vpop.eup %1154  ;;  %1050 = vmatpush1.bf16.msra.mxu0 %v1049_v61  ;;  %v1057_v3 = vpack.c.bf16 %v1153_v0, %v1151_v60  ;;  %1174 = vtanh.f32 %v368_v53 }
  0xb0   : > { %v1157_v5 = vpop.eup %1156  ;;  %1176 = vtanh.f32 %v376_v59 }
  0xb1   : > { %v1159_v7 = vpop.eup %1158  ;;  %1058 = vmatpush1.bf16.msra.mxu1 %v1057_v3  ;;  %v1059_v42 = vpack.c.bf16 %v1157_v5, %v1155_v62  ;;  %1178 = vtanh.f32 %v365_v63 }
  0xb2   : > { %v1161_v8 = vpop.eup %1160  ;;  %1026 = vmatmul.mubr.msk.f32.vlgmr.msra.gmra.mrb[0].mxu0 %vm430_vm0, %v409_v4  ;;  %1180 = vtanh.f32 %v373_v2 }
  0xb3   : > { %v1163_v9 = vpop.eup %1162  ;;  %1060 = vmatprep.subr.bf16.mxu0 %v1059_v42  ;;  %v1067_v10 = vpack.c.bf16 %v1161_v8, %v1159_v7  ;;  %510 = vmatprep.mubr.f32.mxu0 %v1299_v12  ;;  %1182 = vtanh.f32 %v367_v43 }
  0xb4   : > { %v1165_v11 = vpop.eup %1164  ;;  %1029 = vmatmul.mubr.msk.f32.vlgmr.msra.gmra.mrb[0].mxu1 %vm430_vm0, %v409_v4  ;;  %1184 = vtanh.f32 %v375_v6 }
  0xb5   : > { %v1167_v54 = vpop.eup %1166  ;;  %1068 = vmatprep.subr.bf16.mxu1 %v1067_v10  ;;  %v1061_v13 = vpack.c.bf16 %v1165_v11, %v1163_v9  ;;  %593 = vmatprep.mubr.f32.mxu1 %v1299_v12 }
  0xb6   : > { %v1169_v14 = vpop.eup %1168  ;;  %1027 = vmatmul.mubr.msk.f32.gmra.mrb[2].mxu0 %vm430_vm0, %v410_v55 }
  0xb7   : > { %v1171_v15 = vpop.eup %1170  ;;  %1062 = vmatpush1.bf16.msra.mxu0 %v1061_v13  ;;  %v1069_v16 = vpack.c.bf16 %v1169_v14, %v1167_v54  ;;  %516 = vmatprep.mubr.f32.mxu0 %v1299_v12 }
  0xb8   : > { %v1173_v17 = vpop.eup %1172  ;;  %1030 = vmatmul.mubr.msk.f32.gmra.mrb[2].mxu1 %vm430_vm0, %v410_v55 }
  0xb9   : > { %v1175_v19 = vpop.eup %1174  ;;  %1070 = vmatpush1.bf16.msra.mxu1 %v1069_v16  ;;  %v1063_v20 = vpack.c.bf16 %v1173_v17, %v1171_v15  ;;  %599 = vmatprep.mubr.f32.mxu1 %v1299_v12 }
  0xba   : > { %v1177_v21 = vpop.eup %1176  ;;  %1028 = vmatmul.mubr.msk.f32.gmra.mrb[4].mxu0 %vm430_vm0, %v411_v18 }
  0xbb   : > { %v1179_v22 = vpop.eup %1178  ;;  %1064 = vmatprep.subr.bf16.mxu0 %v1063_v20  ;;  %v1071_v23 = vpack.c.bf16 %v1177_v21, %v1175_v19  ;;  %670 = vmatprep.mubr.f32.mxu0 %v1299_v12 }
  0xbc   : > { %v1181_v26 = vpop.eup %1180  ;;  %1031 = vmatmul.mubr.msk.f32.gmra.mrb[4].mxu1 %vm430_vm0, %v411_v18 }
  0xbd   : > { %v1183_v27 = vpop.eup %1182  ;;  %1072 = vmatprep.subr.bf16.mxu1 %v1071_v23  ;;  %v1065_v28 = vpack.c.bf16 %v1181_v26, %v1179_v22  ;;  %753 = vmatprep.mubr.f32.mxu1 %v1299_v12 }
  0xbe   : > { %v1185_v29 = vpop.eup %1184 }
  0xbf   : > { %1066 = vmatpush1.bf16.msra.mxu0 %v1065_v28  ;;  %v1073_v30 = vpack.c.bf16 %v1185_v29, %v1183_v27 }
  0xc1   : > { %1074 = vmatpush1.bf16.msra.mxu1 %v1073_v30 }
  0xc2   : > { %1032 = vmatmul.mubr.msk.f32.vlgmr.msra.gmra.mrb[6].mxu0 %vm430_vm0, %v409_v4 }
  0xc3   : > { %676 = vmatprep.mubr.f32.mxu0 %v1299_v12 }
  0xc4   : > { %1035 = vmatmul.mubr.msk.f32.vlgmr.msra.gmra.mrb[6].mxu1 %vm430_vm0, %v409_v4 }
  0xc5   : > { %759 = vmatprep.mubr.f32.mxu1 %v1299_v12 }
  0xc6   : > { %1033 = vmatmul.mubr.msk.f32.gmra.mrb[8].mxu0 %vm430_vm0, %v410_v55 }
  0xc7   : > { %682 = vmatprep.mubr.f32.mxu0 %v1299_v12 }
  0xc8   : > { %1036 = vmatmul.mubr.msk.f32.gmra.mrb[8].mxu1 %vm430_vm0, %v410_v55 }
  0xc9   : > { %765 = vmatprep.mubr.f32.mxu1 %v1299_v12 }
  0xca   : > { %1034 = vmatmul.mubr.msk.f32.gmra.mrb[10].mxu0 %vm430_vm0, %v411_v18 }
  0xcc   : > { %1037 = vmatmul.mubr.msk.f32.gmra.mrb[10].mxu1 %vm430_vm0, %v411_v18 }
 0x185   : > { %v506_v34 = vpop.f32.mrb[0].mxu0 }
 0x186   : > { %v1582_v35 = vadd.f32 %v506_v34, %v1577_v31  ;;  %v508_v36 = vpop.f32.mrb[1].mxu0 }
 0x187   : > { %v589_v25 = vpop.f32.mrb[0].mxu1  ;;  %v1585_v37 = vadd.f32 %v508_v36, %v1577_v31 }
 0x188   : > { %v772_v12 = vrot.slane %v1582_v35, 4  ;;  %v1589_v38 = vadd.f32 %v589_v25, %v1577_v31  ;;  %v591_v33 = vpop.f32.mrb[1].mxu1 }
 0x189   : > { %v778_v40 = vrot.slane %v1585_v37, 4  ;;  %v1595_v41 = vadd.f32 %v591_v33, %v1577_v31  ;;  %v512_v44 = vpop.f32.mrb[2].mxu0 }
 0x18a   : > { %v773_v45 = vmax.f32 %v1582_v35, %v772_v12  ;;  %v784_v46 = vrot.slane %v1589_v38, 4  ;;  %v513_v47 = vadd.f32 %v512_v44, %v1591_v39  ;;  %v514_v48 = vpop.f32.mrb[3].mxu0 }
 0x18b   : > { %v779_v24 = vmax.f32 %v1585_v37, %v778_v40  ;;  %v790_v49 = vrot.slane %v1595_v41, 4  ;;  %v595_v51 = vpop.f32.mrb[2].mxu1  ;;  %v515_v52 = vadd.f32 %v514_v48, %v1591_v39 }
 0x18c   : > { %v774_v32 = vrot.slane %v773_v45, 2  ;;  %v785_v50 = vmax.f32 %v1589_v38, %v784_v46  ;;  %932 = vst [vmem:[%s1604_s7 + $0x40] sm:$0xff] %v513_v47  ;;  %v596_v53 = vadd.f32 %v595_v51, %v1591_v39  ;;  %v597_v56 = vpop.f32.mrb[3].mxu1 }
 0x18d   : > { %v780_v59 = vrot.slane %v779_v24, 2  ;;  %v791_v60 = vmax.f32 %v1595_v41, %v790_v49  ;;  %933 = vst [vmem:[%s1604_s7 + $0x48] sm:$0xff] %v515_v52  ;;  %v598_v58 = vadd.f32 %v597_v56, %v1591_v39  ;;  %v518_v61 = vpop.f32.mrb[4].mxu0 }
 0x18e   : > { %v775_v63 = vmax.f32 %v773_v45, %v774_v32  ;;  %v786_v0 = vrot.slane %v785_v50, 2  ;;  %934 = vst [vmem:[%s1604_s7 + $0x50] sm:$0xff] %v596_v53  ;;  %v519_v1 = vadd.f32 %v518_v61, %v1608_v57  ;;  %v520_v2 = vpop.f32.mrb[5].mxu0 }
 0x18f   : > { %v781_v62 = vmax.f32 %v779_v24, %v780_v59  ;;  %v792_v3 = vrot.slane %v791_v60, 2  ;;  %935 = vst [vmem:[%s1604_s7 + $0x58] sm:$0xff] %v598_v58  ;;  %v601_v4 = vpop.f32.mrb[4].mxu1  ;;  %v521_v43 = vadd.f32 %v520_v2, %v1608_v57 }
 0x190   : > { %v776_v5 = vrot.slane %v775_v63, 1  ;;  %v787_v6 = vmax.f32 %v785_v50, %v786_v0  ;;  %v908_v7 = vmul.f32 1.442695, %v519_v1  ;;  %v602_v42 = vadd.f32 %v601_v4, %v1608_v57  ;;  %v603_v8 = vpop.f32.mrb[5].mxu1 }
 0x191   : > { %v782_v9 = vrot.slane %v781_v62, 1  ;;  %v793_v10 = vmax.f32 %v791_v60, %v792_v3  ;;  %v910_v55 = vmul.f32 1.442695, %v521_v43  ;;  %v604_v11 = vadd.f32 %v603_v8, %v1608_v57 }
 0x192   : > { %v777_v54 = vmax.f32 %v775_v63, %v776_v5  ;;  %v788_v13 = vrot.slane %v787_v6, 1  ;;  %1186 = vpow2.f32 %v908_v7  ;;  %v912_v14 = vmul.f32 1.442695, %v602_v42 }
 0x193   : > { %v783_v15 = vmax.f32 %v781_v62, %v782_v9  ;;  %v794_v16 = vrot.slane %v793_v10, 1  ;;  %1188 = vpow2.f32 %v910_v55  ;;  %v914_v18 = vmul.f32 1.442695, %v604_v11 }
 0x194   : > { %v820_v17 = vsub.f32 %v1582_v35, %v777_v54  ;;  %v789_v19 = vmax.f32 %v787_v6, %v788_v13  ;;  %1190 = vpow2.f32 %v912_v14 }
 0x195   : > { %v821_v20 = vsub.f32 %v1585_v37, %v783_v15  ;;  %v795_v21 = vmax.f32 %v793_v10, %v794_v16  ;;  %1192 = vpow2.f32 %v914_v18  ;;  %v672_v22 = vpop.f32.mrb[6].mxu0 }
 0x196   : > { %v828_v23 = vmul.f32 1.442695, %v820_v17  ;;  %v822_v26 = vsub.f32 %v1589_v38, %v789_v19  ;;  %v1623_v27 = vadd.f32 %v672_v22, %v1577_v31  ;;  %v674_v28 = vpop.f32.mrb[7].mxu0 }
 0x197   : > { %v830_v29 = vmul.f32 1.442695, %v821_v20  ;;  %v823_v30 = vsub.f32 %v1595_v41, %v795_v21  ;;  %v755_v34 = vpop.f32.mrb[6].mxu1  ;;  %v1627_v35 = vadd.f32 %v674_v28, %v1577_v31 }
 0x198   : > { %1194 = vpow2.f32 %v828_v23  ;;  %v832_v36 = vmul.f32 1.442695, %v822_v26  ;;  %v796_v25 = vrot.slane %v1623_v27, 4  ;;  %v1631_v37 = vadd.f32 %v755_v34, %v1577_v31  ;;  %v757_v12 = vpop.f32.mrb[7].mxu1 }
 0x199   : > { %1196 = vpow2.f32 %v830_v29  ;;  %v834_v38 = vmul.f32 1.442695, %v823_v30  ;;  %v802_v33 = vrot.slane %v1627_v35, 4  ;;  %v1635_v40 = vadd.f32 %v757_v12, %v1577_v31  ;;  %v678_v41 = vpop.f32.mrb[8].mxu0 }
 0x19a   : > { %1198 = vpow2.f32 %v832_v36  ;;  %v797_v44 = vmax.f32 %v1623_v27, %v796_v25  ;;  %v808_v45 = vrot.slane %v1631_v37, 4  ;;  %v679_v46 = vadd.f32 %v678_v41, %v1591_v39  ;;  %v680_v47 = vpop.f32.mrb[9].mxu0 }
 0x19b   : > { %1200 = vpow2.f32 %v834_v38  ;;  %v803_v48 = vmax.f32 %v1627_v35, %v802_v33  ;;  %v814_v24 = vrot.slane %v1635_v40, 4  ;;  %v761_v49 = vpop.f32.mrb[8].mxu1  ;;  %v681_v31 = vadd.f32 %v680_v47, %v1591_v39 }
 0x19c   : > { %v1187_v51 = vpop.eup %1186  ;;  %v798_v52 = vrot.slane %v797_v44, 2  ;;  %v809_v32 = vmax.f32 %v1631_v37, %v808_v45  ;;  %936 = vst [vmem:[%s1604_s7 + $0x60] sm:$0xff] %v679_v46  ;;  %v762_v50 = vadd.f32 %v761_v49, %v1591_v39  ;;  %v763_v53 = vpop.f32.mrb[9].mxu1 }
 0x19d   : > { %v1189_v56 = vpop.eup %1188  ;;  %940 = vst [vmem:[%s1604_s7 + $0x80] sm:$0xff] %v1187_v51  ;;  %v804_v59 = vrot.slane %v803_v48, 2  ;;  %v815_v60 = vmax.f32 %v1635_v40, %v814_v24  ;;  %937 = vst [vmem:[%s1604_s7 + $0x68] sm:$0xff] %v681_v31  ;;  %v764_v58 = vadd.f32 %v763_v53, %v1591_v39  ;;  %v684_v61 = vpop.f32.mrb[10].mxu0 }
 0x19e   : > { %v1191_v63 = vpop.eup %1190  ;;  %941 = vst [vmem:[%s1604_s7 + $0x88] sm:$0xff] %v1189_v56  ;;  %v799_v0 = vmax.f32 %v797_v44, %v798_v52  ;;  %v810_v1 = vrot.slane %v809_v32, 2  ;;  %938 = vst [vmem:[%s1604_s7 + $0x70] sm:$0xff] %v762_v50  ;;  %v685_v2 = vadd.f32 %v684_v61, %v1608_v57  ;;  %v686_v62 = vpop.f32.mrb[11].mxu0 }
 0x19f   : > { %v1193_v3 = vpop.eup %1192  ;;  %942 = vst [vmem:[%s1604_s7 + $0x90] sm:$0xff] %v1191_v63  ;;  %v805_v4 = vmax.f32 %v803_v48, %v804_v59  ;;  %v816_v43 = vrot.slane %v815_v60, 2  ;;  %939 = vst [vmem:[%s1604_s7 + $0x78] sm:$0xff] %v764_v58  ;;  %v767_v5 = vpop.f32.mrb[10].mxu1  ;;  %v687_v6 = vadd.f32 %v686_v62, %v1608_v57 }
 0x1a0   : > { %943 = vst [vmem:[%s1604_s7 + $0x98] sm:$0xff] %v1193_v3  ;;  %v800_v39 = vrot.slane %v799_v0, 1  ;;  %v811_v7 = vmax.f32 %v809_v32, %v810_v1  ;;  %v916_v42 = vmul.f32 1.442695, %v685_v2  ;;  %v768_v8 = vadd.f32 %v767_v5, %v1608_v57  ;;  %v769_v9 = vpop.f32.mrb[11].mxu1 }
 0x1a1   : > { %v806_v10 = vrot.slane %v805_v4, 1  ;;  %v817_v55 = vmax.f32 %v815_v60, %v816_v43  ;;  %v918_v11 = vmul.f32 1.442695, %v687_v6  ;;  %v770_v54 = vadd.f32 %v769_v9, %v1608_v57 }
 0x1a2   : > { %v1659_v13 = vpop.eup %1194  ;;  %v801_v14 = vmax.f32 %v799_v0, %v800_v39  ;;  %v812_v15 = vrot.slane %v811_v7, 1  ;;  %1202 = vpow2.f32 %v916_v42  ;;  %v920_v16 = vmul.f32 1.442695, %v768_v8 }
 0x1a3   : > { %v1661_v18 = vpop.eup %1196  ;;  %v844_v17 = vrot.slane %v1659_v13, 4  ;;  %v807_v19 = vmax.f32 %v805_v4, %v806_v10  ;;  %v818_v20 = vrot.slane %v817_v55, 1  ;;  %1204 = vpow2.f32 %v918_v11 }
 0x1a4   : > { %v1664_v21 = vpop.eup %1198  ;;  %v850_v22 = vrot.slane %v1661_v18, 4  ;;  %v824_v23 = vsub.f32 %v1623_v27, %v801_v14  ;;  %v813_v57 = vmax.f32 %v811_v7, %v812_v15  ;;  %1206 = vpow2.f32 %v920_v16 }
 0x1a5   : > { %v1668_v26 = vpop.eup %1200  ;;  %v845_v28 = vadd.f32 %v1659_v13, %v844_v17  ;;  %v856_v29 = vrot.slane %v1664_v21, 4  ;;  %v825_v30 = vsub.f32 %v1627_v35, %v807_v19  ;;  %v819_v34 = vmax.f32 %v817_v55, %v818_v20 }
 0x1a6   : > { %v851_v36 = vadd.f32 %v1661_v18, %v850_v22  ;;  %v862_v25 = vrot.slane %v1668_v26, 4  ;;  %v836_v12 = vmul.f32 1.442695, %v824_v23  ;;  %v826_v38 = vsub.f32 %v1631_v37, %v813_v57 }
 0x1a7   : > { %v846_v33 = vrot.slane %v845_v28, 2  ;;  %v857_v27 = vadd.f32 %v1664_v21, %v856_v29  ;;  %v838_v41 = vmul.f32 1.442695, %v825_v30  ;;  %v827_v44 = vsub.f32 %v1635_v40, %v819_v34 }
 0x1a8   : > { %v852_v45 = vrot.slane %v851_v36, 2  ;;  %v863_v46 = vadd.f32 %v1668_v26, %v862_v25  ;;  %1208 = vpow2.f32 %v836_v12  ;;  %v840_v47 = vmul.f32 1.442695, %v826_v38 }
 0x1a9   : > { %v847_v35 = vadd.f32 %v846_v33, %v845_v28  ;;  %v858_v48 = vrot.slane %v857_v27, 2  ;;  %1210 = vpow2.f32 %v838_v41  ;;  %v842_v24 = vmul.f32 1.442695, %v827_v44 }
 0x1aa   : > { %v853_v49 = vadd.f32 %v852_v45, %v851_v36  ;;  %v864_v31 = vrot.slane %v863_v46, 2  ;;  %1212 = vpow2.f32 %v840_v47  ;;  %v922_v37 = vmul.f32 1.442695, %v770_v54 }
 0x1ab   : > { %v848_v51 = vrot.slane %v847_v35, 1  ;;  %v859_v52 = vadd.f32 %v858_v48, %v857_v27  ;;  %1214 = vpow2.f32 %v842_v24 }
 0x1ac   : > { %v1203_v40 = vpop.eup %1202  ;;  %v854_v32 = vrot.slane %v853_v49, 1  ;;  %v865_v50 = vadd.f32 %v864_v31, %v863_v46  ;;  %1216 = vpow2.f32 %v922_v37 }
 0x1ad   : > { %v1205_v53 = vpop.eup %1204  ;;  %v849_v56 = vadd.f32 %v848_v51, %v847_v35  ;;  %v860_v59 = vrot.slane %v859_v52, 1  ;;  %944 = vst [vmem:[%s1604_s7 + $0xa0] sm:$0xff] %v1203_v40 }
 0x1ae   : > { %v1207_v60 = vpop.eup %1206  ;;  %v855_v58 = vadd.f32 %v854_v32, %v853_v49  ;;  %v866_v61 = vrot.slane %v865_v50, 1  ;;  %945 = vst [vmem:[%s1604_s7 + $0xa8] sm:$0xff] %v1205_v53 }
 0x1af   : > { %1218 = vrcp.f32 %v849_v56  ;;  %v861_v63 = vadd.f32 %v860_v59, %v859_v52  ;;  %946 = vst [vmem:[%s1604_s7 + $0xb0] sm:$0xff] %v1207_v60 }
 0x1b0   : > { %1220 = vrcp.f32 %v855_v58  ;;  %v867_v0 = vadd.f32 %v866_v61, %v865_v50 }
 0x1b1   : > { %1222 = vrcp.f32 %v861_v63 }
 0x1b2   : > { %v1209_v1 = vpop.eup %1208  ;;  %1224 = vrcp.f32 %v867_v0 }
 0x1b3   : > { %v1211_v2 = vpop.eup %1210  ;;  %v868_v62 = vrot.slane %v1209_v1, 4 }
 0x1b4   : > { %v1213_v3 = vpop.eup %1212  ;;  %v874_v4 = vrot.slane %v1211_v2, 4 }
 0x1b5   : > { %v1215_v43 = vpop.eup %1214  ;;  %v869_v5 = vadd.f32 %v1209_v1, %v868_v62  ;;  %v880_v6 = vrot.slane %v1213_v3, 4 }
 0x1b6   : > { %v1217_v39 = vpop.eup %1216  ;;  %v875_v7 = vadd.f32 %v1211_v2, %v874_v4  ;;  %v886_v42 = vrot.slane %v1215_v43, 4 }
 0x1b7   : > { %v870_v8 = vrot.slane %v869_v5, 2  ;;  %v881_v9 = vadd.f32 %v1213_v3, %v880_v6  ;;  %947 = vst [vmem:[%s1604_s7 + $0xb8] sm:$0xff] %v1217_v39 }
 0x1b8   : > { %v876_v10 = vrot.slane %v875_v7, 2  ;;  %v887_v55 = vadd.f32 %v1215_v43, %v886_v42 }
 0x1b9   : > { %v1219_v11 = vpop.eup %1218  ;;  %v871_v54 = vadd.f32 %v870_v8, %v869_v5  ;;  %v882_v14 = vrot.slane %v881_v9, 2 }
 0x1ba   : > { %v1221_v15 = vpop.eup %1220  ;;  %v900_v16 = vmul.f32 %v1219_v11, %v1659_v13  ;;  %v877_v17 = vadd.f32 %v876_v10, %v875_v7  ;;  %v888_v19 = vrot.slane %v887_v55, 2 }
 0x1bb   : > { %v1223_v20 = vpop.eup %1222  ;;  %v901_v22 = vmul.f32 %v1221_v15, %v1661_v18  ;;  %v872_v23 = vrot.slane %v871_v54, 1  ;;  %v883_v57 = vadd.f32 %v882_v14, %v881_v9 }
 0x1bc   : > { %v1225_v28 = vpop.eup %1224  ;;  %924 = vst [vmem:[%s1604_s7] sm:$0xff] %v900_v16  ;;  %v902_v29 = vmul.f32 %v1223_v20, %v1664_v21  ;;  %v878_v30 = vrot.slane %v877_v17, 1  ;;  %v889_v34 = vadd.f32 %v888_v19, %v887_v55 }
 0x1bd   : > { %925 = vst [vmem:[%s1604_s7 + $0x8] sm:$0xff] %v901_v22  ;;  %v903_v13 = vmul.f32 %v1225_v28, %v1668_v26  ;;  %v873_v36 = vadd.f32 %v872_v23, %v871_v54  ;;  %v884_v25 = vrot.slane %v883_v57, 1 }
 0x1be   : > { %926 = vst [vmem:[%s1604_s7 + $0x10] sm:$0xff] %v902_v29  ;;  %v879_v12 = vadd.f32 %v878_v30, %v877_v17  ;;  %v890_v38 = vrot.slane %v889_v34, 1 }
 0x1bf   : > { %927 = vst [vmem:[%s1604_s7 + $0x18] sm:$0xff] %v903_v13  ;;  %1226 = vrcp.f32 %v873_v36  ;;  %v885_v18 = vadd.f32 %v884_v25, %v883_v57 }
 0x1c0   : > { %1228 = vrcp.f32 %v879_v12  ;;  %v891_v33 = vadd.f32 %v890_v38, %v889_v34 }
 0x1c1   : > { %1230 = vrcp.f32 %v885_v18 }
 0x1c2   : > { %1232 = vrcp.f32 %v891_v33 }
 0x1c9   : > { %v1227_v21 = vpop.eup %1226 }
 0x1ca   : > { %v1229_v26 = vpop.eup %1228  ;;  %v904_v27 = vmul.f32 %v1227_v21, %v1209_v1 }
 0x1cb   : > { %v1231_v41 = vpop.eup %1230  ;;  %v905_v44 = vmul.f32 %v1229_v26, %v1211_v2 }
 0x1cc   : > { %v1233_v45 = vpop.eup %1232  ;;  %928 = vst [vmem:[%s1604_s7 + $0x20] sm:$0xff] %v904_v27  ;;  %v906_v46 = vmul.f32 %v1231_v41, %v1213_v3 }
 0x1cd   : > { %929 = vst [vmem:[%s1604_s7 + $0x28] sm:$0xff] %v905_v44  ;;  %v907_v47 = vmul.f32 %v1233_v45, %v1215_v43 }
 0x1ce   : > { %930 = vst [vmem:[%s1604_s7 + $0x30] sm:$0xff] %v906_v46 }
 0x1cf   : > { %931 = vst [vmem:[%s1604_s7 + $0x38] sm:$0xff] %v907_v47 }
 0x1d0   : > { %1247 = shalt.err (!%p1244_p3)
}
 0x1d1   : > { %s1248_s17 = scalar_lea.hbm %s1696_s12, 3072  ;;  %s1252_s26 = scalar_lea.hbm %s1752_s5, 6144 }
 0x1d2   : > { %p1249_p4 = scmp.ne.s32.totalorder %s1696_s12, %s1248_s17  ;;  %p1253_p9 = scmp.lt.u32.totalorder %s1696_s12, %s1752_s5 }
 0x1d3   : > { %p1254_p10 = scmp.lt.u32.totalorder %s1252_s26, %s1248_s17  ;;  %p1256_p12 = scmp.lt.u32.totalorder %s1248_s17, %s1696_s12 }
 0x1d4   : > { %p1250_p7 = pnand %p1249_p4, %p1372_p5 }
 0x1d5   : > { %p1255_p11 = por %p1254_p10, %p1253_p9 }
 0x1d6   : > { %p1251_p8 = pneg %p1250_p7 }
 0x1d7   : > { %p1257_p13 = por %p1256_p12, %p1255_p11 }
 0x1d9   : > { %p1258_p0 = pnand %p1257_p13, %p1251_p8 }
 0x1db   : > { %1261 = shalt.err (!%p1258_p0)
}
 0x1dc   : > { %s1301_s7 = smov 1024   ;;  %s1302_s8 = smov 2048  }
 0x1dd   : > { %s1303_s10 = smov 64  }
 0x1de   : > { %1076 = dma.vmem_to_hbm [thread:$0]  (%p1372_p5), %s1699_s9, 3072, %s1696_s12, %s1706_s22, %s1301_s7, %s1302_s8, %s1303_s10  }
 0x1df PF: > { %p1082_p1 = scmp.ge.s32.totalorder %s1296_s21, 2  ;;  %s977_s11 = sand.u32 1, %s1284_s18  }
 0x1e0   : > { %s978_s13 = scalar_lea.sflag [#allocation3], %s977_s11 }
 0x1e1   : > { %p1079_p2 = pnand %p1082_p1, %p1376_p6 }
 0x1e3   : > { %1279 = dma.done.wait (!%p1079_p2), %s978_s13, 3072  }
 0x1e4   : > { %1281 = vsyncadd (!%p1079_p2), %s978_s13, 4294964224  ;;  %p15_p3 = scmp.ge.s32.totalorder %s1359_s24, 4   ;;  %s1755_s18 = smov %s1288_s19 }
 0x1e5   : > { %s1756_s19 = smov %s1292_s20  ;;  %s1757_s20 = smov %s1370_s27 }
 0x1e6   : > { %s1758_s21 = smov %s1359_s24  ;;  %17 = sbr.rel (!%p15_p3) target bundleno = 3 (0x3), region = 75 }
 0x1ed   :  { %983 = vsyncpa [#allocation3], 1 }
 0x1ee   :  { %985 = vsyncpa [#allocation3 + $0x1], 1 }

</bundles_post_ra>
